<compile_context>
chip_gen: v6e
topology: v6e:2x2x1
jax: 0.10.0
libtpu: 0.0.40
codegen_flags: <defaults>
</compile_context>

<pallas_src>
import math

import jax
import jax.numpy as jnp
import numpy as np
from jax import lax
from jax.experimental import pallas as pl
from jax.experimental.pallas import tpu as pltpu

# ---- static configuration (small shapes consistent with the module) ----
TEAM = 3                 # team_size
P = TEAM * TEAM          # number of (i, j) hero pairs = 9
H = 32                   # hidden_dim
MLP_H = 50               # MLP hidden width (fixed to 50 in the module)
N_HERO = 20
B = 16                   # batch


def blade_chest_kernel(a_idx_ref, b_idx_ref, blade_ref, chest_ref,
                       w_att_ref, b_att_ref, w1_ref, b1_ref, w2_ref, b2_ref,
                       out_ref):
    N = a_idx_ref.shape[0]            # B * team**2 pair rows, ordered (j, i, b)
    n_hero = blade_ref.shape[0]
    Bsz = out_ref.shape[0]
    team = math.isqrt(N // Bsz)
    G = team * Bsz                    # number of softmax groups = B * team
    f32 = jnp.float32

    # ---- fused embedding gather: one-hot(pair hero id) @ table (exact, MXU) --
    hero = lax.broadcasted_iota(jnp.int32, (N, n_hero), 1)
    oh_a = (a_idx_ref[...] == hero).astype(f32)                           # (N, n_hero)
    oh_b = (b_idx_ref[...] == hero).astype(f32)
    a = jnp.dot(oh_a, blade_ref[...], preferred_element_type=f32)         # (N, H)
    b = jnp.dot(oh_b, chest_ref[...], preferred_element_type=f32)         # (N, H)

    # ---- MLP branch: Linear(H,50) -> ReLU -> Dropout(id) -> Linear(50,1) -> ReLU
    interact = a * b
    h1 = jnp.dot(interact, w1_ref[...], preferred_element_type=f32) + b1_ref[...]
    h1 = jnp.maximum(h1, 0.0)                                             # (N, 50)
    mlp = jnp.dot(h1, w2_ref[...], preferred_element_type=f32) + b2_ref[0, 0]
    mlp = jnp.maximum(mlp, 0.0)                                           # (N, 1)

    # ---- attention branch: score = (W a + b_att) . b ------------------------
    wa = jnp.dot(a, w_att_ref[...], preferred_element_type=f32) + b_att_ref[...]
    score = jnp.sum(wa * b, axis=-1, keepdims=True)                       # (N, 1)

    # ---- per-group softmax over j (exact per-group max shift, no matmuls) ---
    # Row order is (j, i, b) with b fastest, so member j of every group is the
    # contiguous, 8-sublane-aligned slab rows [j*G, (j+1)*G).
    s = [score[j * G:(j + 1) * G, :] for j in range(team)]                # team x (G,1)
    m = [mlp[j * G:(j + 1) * G, :] for j in range(team)]
    gmax = s[0]
    for j in range(1, team):
        gmax = jnp.maximum(gmax, s[j])
    e = [jnp.exp(sj - gmax) for sj in s]
    den = e[0]
    num = m[0] * e[0]
    for j in range(1, team):
        den = den + e[j]
        num = num + m[j] * e[j]
    gv = num * pl.reciprocal(den, approx=False)                           # (G,1), g = i*Bsz + b

    # ---- sum the `team` group values of each batch row (contiguous slabs) ---
    acc = gv[0:Bsz, :]
    for i in range(1, team):
        acc = acc + gv[i * Bsz:(i + 1) * Bsz, :]
    out_ref[...] = acc                                                    # (B, 1)


@jax.jit
def blade_chest_forward(team_A, team_B, params):
    Bsz, team = team_A.shape
    N = Bsz * team * team

    # pair-row hero indices, row r <-> (j, i, b) with b fastest:
    #   a_idx[r] = team_A[b, i]   (blade side, constant across j)
    #   b_idx[r] = team_B[b, j]   (chest side, constant across i)
    tA = team_A.astype(jnp.int32)
    tB = team_B.astype(jnp.int32)
    a_idx = jnp.broadcast_to(tA.T[None, :, :], (team, team, Bsz)).reshape(N, 1)
    b_idx = jnp.broadcast_to(tB.T[:, None, :], (team, team, Bsz)).reshape(N, 1)

    n_hero, hdim = params['blade'].shape
    mlp_h = params['w1'].shape[1]
    flops = (2 * N * n_hero * hdim * 2      # two one-hot gather matmuls
             + 2 * N * hdim * mlp_h         # MLP layer 1
             + 2 * N * mlp_h                # MLP layer 2
             + 2 * N * hdim * hdim          # attention W
             + 8 * N * hdim)                # elementwise
    bytes_accessed = 4 * (2 * N + 2 * n_hero * hdim + hdim * hdim + hdim
                          + hdim * mlp_h + mlp_h + mlp_h + 1 + Bsz)

    vmem = pl.BlockSpec(memory_space=pltpu.MemorySpace.VMEM)
    smem = pl.BlockSpec(memory_space=pltpu.MemorySpace.SMEM)

    out = pl.pallas_call(
        blade_chest_kernel,
        out_shape=jax.ShapeDtypeStruct((Bsz, 1), jnp.float32),
        in_specs=[vmem] * 9 + [smem],        # b2 scalar lives in SMEM
        out_specs=vmem,
        cost_estimate=pl.CostEstimate(flops=flops,
                                      transcendentals=N,
                                      bytes_accessed=bytes_accessed),
    )(a_idx, b_idx, params['blade'], params['chest'],
      params['w_att'], params['b_att'], params['w1'], params['b1'],
      params['w2'], params['b2'])

    return out                               # (B, 1), matches the module output


def reference(team_A, team_B, params):
    """Pure-JAX reference matching the PyTorch forward (eval mode)."""
    index1 = jnp.repeat(jnp.arange(TEAM), TEAM)
    index2 = jnp.tile(jnp.arange(TEAM), TEAM)
    a = params['blade'][team_A[:, index1]]         # (B, P, H)
    b = params['chest'][team_B[:, index2]]
    interact = a * b
    h1 = jax.nn.relu(interact @ params['w1'] + params['b1'][0])
    mlp = jax.nn.relu((h1 @ params['w2'])[..., 0] + params['b2'][0, 0])
    wa = a @ params['w_att'] + params['b_att'][0]
    score = jnp.sum(wa * b, axis=-1)               # (B, P)
    score = jax.nn.softmax(score.reshape(-1, TEAM, TEAM), axis=2).reshape(-1, P)
    return jnp.sum(mlp * score, axis=1, keepdims=True)


if __name__ == "__main__":
    key = jax.random.PRNGKey(0)
    ks = jax.random.split(key, 10)
    params = {
        'blade': jax.random.normal(ks[0], (N_HERO, H), jnp.float32),
        'chest': jax.random.normal(ks[1], (N_HERO, H), jnp.float32),
        'w_att': jax.random.normal(ks[2], (H, H), jnp.float32) / jnp.sqrt(H),
        'b_att': jax.random.normal(ks[3], (1, H), jnp.float32) * 0.1,
        'w1':    jax.random.normal(ks[4], (H, MLP_H), jnp.float32) / jnp.sqrt(H),
        'b1':    jax.random.normal(ks[5], (1, MLP_H), jnp.float32) * 0.1,
        'w2':    jax.random.normal(ks[6], (MLP_H, 1), jnp.float32) / jnp.sqrt(MLP_H),
        'b2':    jax.random.normal(ks[7], (1, 1), jnp.float32) * 0.1,
    }
    team_A = jax.random.randint(ks[8], (B, TEAM), 0, N_HERO, dtype=jnp.int32)
    team_B = jax.random.randint(ks[9], (B, TEAM), 0, N_HERO, dtype=jnp.int32)

    out = blade_chest_forward(team_A, team_B, params)
    out = jax.block_until_ready(out)
    assert out.shape == (B, 1)

    ref = reference(team_A, team_B, params)
    np.testing.assert_allclose(np.asarray(out), np.asarray(ref), rtol=1e-4, atol=1e-4)

    print("KERNEL_OK")
</pallas_src>

<mosaic_0001>
module attributes {stable_mosaic.version = 11 : i64} {
  func.func @blade_chest_kernel(%arg0: memref<144x1xi32, #tpu.memory_space<vmem>>, %arg1: memref<144x1xi32, #tpu.memory_space<vmem>>, %arg2: memref<20x32xf32, #tpu.memory_space<vmem>>, %arg3: memref<20x32xf32, #tpu.memory_space<vmem>>, %arg4: memref<32x32xf32, #tpu.memory_space<vmem>>, %arg5: memref<1x32xf32, #tpu.memory_space<vmem>>, %arg6: memref<32x50xf32, #tpu.memory_space<vmem>>, %arg7: memref<1x50xf32, #tpu.memory_space<vmem>>, %arg8: memref<50x1xf32, #tpu.memory_space<vmem>>, %arg9: memref<1x1xf32, #tpu.memory_space<smem>>, %arg10: memref<16x1xf32, #tpu.memory_space<vmem>>) attributes {dimension_semantics = [], scalar_prefetch = 0 : i64, scratch_operands = 0 : i64, tpu.core_type = #tpu.core_type<tc>} {
    %0 = tpu.iota {dimensions = array<i32: 1>} : vector<144x20xi32>
    %c0 = arith.constant 0 : index
    %c0_0 = arith.constant 0 : index
    %1 = vector.load %arg0[%c0, %c0_0] : memref<144x1xi32, #tpu.memory_space<vmem>>, vector<144x1xi32>
    %2 = vector.broadcast %1 : vector<144x1xi32> to vector<144x20xi32>
    %3 = arith.cmpi eq, %2, %0 : vector<144x20xi32>
    %4 = arith.extui %3 : vector<144x20xi1> to vector<144x20xi32>
    %5 = arith.sitofp %4 : vector<144x20xi32> to vector<144x20xf32>
    %c0_1 = arith.constant 0 : index
    %c0_2 = arith.constant 0 : index
    %6 = vector.load %arg1[%c0_1, %c0_2] : memref<144x1xi32, #tpu.memory_space<vmem>>, vector<144x1xi32>
    %7 = vector.broadcast %6 : vector<144x1xi32> to vector<144x20xi32>
    %8 = arith.cmpi eq, %7, %0 : vector<144x20xi32>
    %9 = arith.extui %8 : vector<144x20xi1> to vector<144x20xi32>
    %10 = arith.sitofp %9 : vector<144x20xi32> to vector<144x20xf32>
    %c0_3 = arith.constant 0 : index
    %c0_4 = arith.constant 0 : index
    %11 = vector.load %arg2[%c0_3, %c0_4] : memref<20x32xf32, #tpu.memory_space<vmem>>, vector<20x32xf32>
    %cst = arith.constant dense<0.000000e+00> : vector<144x32xf32>
    %12 = tpu.matmul %5, %11, %cst {dimension_numbers = #tpu.dot_dimension_numbers<[1], [0], [0], [1], [0, 0, 1, 1], [], []>} : vector<144x20xf32>, vector<20x32xf32>, vector<144x32xf32> -> vector<144x32xf32>
    %c0_5 = arith.constant 0 : index
    %c0_6 = arith.constant 0 : index
    %13 = vector.load %arg3[%c0_5, %c0_6] : memref<20x32xf32, #tpu.memory_space<vmem>>, vector<20x32xf32>
    %cst_7 = arith.constant dense<0.000000e+00> : vector<144x32xf32>
    %14 = tpu.matmul %10, %13, %cst_7 {dimension_numbers = #tpu.dot_dimension_numbers<[1], [0], [0], [1], [0, 0, 1, 1], [], []>} : vector<144x20xf32>, vector<20x32xf32>, vector<144x32xf32> -> vector<144x32xf32>
    %15 = arith.mulf %12, %14 : vector<144x32xf32>
    %c0_8 = arith.constant 0 : index
    %c0_9 = arith.constant 0 : index
    %16 = vector.load %arg6[%c0_8, %c0_9] : memref<32x50xf32, #tpu.memory_space<vmem>>, vector<32x50xf32>
    %cst_10 = arith.constant dense<0.000000e+00> : vector<144x50xf32>
    %17 = tpu.matmul %15, %16, %cst_10 {dimension_numbers = #tpu.dot_dimension_numbers<[1], [0], [0], [1], [0, 0, 1, 1], [], []>} : vector<144x32xf32>, vector<32x50xf32>, vector<144x50xf32> -> vector<144x50xf32>
    %c0_11 = arith.constant 0 : index
    %c0_12 = arith.constant 0 : index
    %18 = vector.load %arg7[%c0_11, %c0_12] : memref<1x50xf32, #tpu.memory_space<vmem>>, vector<1x50xf32>
    %19 = vector.broadcast %18 : vector<1x50xf32> to vector<144x50xf32>
    %20 = arith.addf %17, %19 : vector<144x50xf32>
    %cst_13 = arith.constant 0.000000e+00 : f32
    %21 = vector.broadcast %cst_13 : f32 to vector<144x50xf32>
    %22 = arith.maximumf %20, %21 : vector<144x50xf32>
    %c0_14 = arith.constant 0 : index
    %c0_15 = arith.constant 0 : index
    %23 = vector.load %arg8[%c0_14, %c0_15] : memref<50x1xf32, #tpu.memory_space<vmem>>, vector<50x1xf32>
    %cst_16 = arith.constant dense<0.000000e+00> : vector<144x1xf32>
    %24 = tpu.matmul %22, %23, %cst_16 {dimension_numbers = #tpu.dot_dimension_numbers<[1], [0], [0], [1], [0, 0, 1, 1], [], []>} : vector<144x50xf32>, vector<50x1xf32>, vector<144x1xf32> -> vector<144x1xf32>
    %c0_17 = arith.constant 0 : index
    %c0_18 = arith.constant 0 : index
    %25 = memref.load %arg9[%c0_17, %c0_18] : memref<1x1xf32, #tpu.memory_space<smem>>
    %26 = vector.broadcast %25 : f32 to vector<144x1xf32>
    %27 = arith.addf %24, %26 : vector<144x1xf32>
    %cst_19 = arith.constant 0.000000e+00 : f32
    %28 = vector.broadcast %cst_19 : f32 to vector<144x1xf32>
    %29 = arith.maximumf %27, %28 : vector<144x1xf32>
    %c0_20 = arith.constant 0 : index
    %c0_21 = arith.constant 0 : index
    %30 = vector.load %arg4[%c0_20, %c0_21] : memref<32x32xf32, #tpu.memory_space<vmem>>, vector<32x32xf32>
    %cst_22 = arith.constant dense<0.000000e+00> : vector<144x32xf32>
    %31 = tpu.matmul %12, %30, %cst_22 {dimension_numbers = #tpu.dot_dimension_numbers<[1], [0], [0], [1], [0, 0, 1, 1], [], []>} : vector<144x32xf32>, vector<32x32xf32>, vector<144x32xf32> -> vector<144x32xf32>
    %c0_23 = arith.constant 0 : index
    %c0_24 = arith.constant 0 : index
    %32 = vector.load %arg5[%c0_23, %c0_24] : memref<1x32xf32, #tpu.memory_space<vmem>>, vector<1x32xf32>
    %33 = vector.broadcast %32 : vector<1x32xf32> to vector<144x32xf32>
    %34 = arith.addf %31, %33 : vector<144x32xf32>
    %35 = arith.mulf %34, %14 : vector<144x32xf32>
    %cst_25 = arith.constant dense<0.000000e+00> : vector<144xf32>
    %36 = vector.multi_reduction <add>, %35, %cst_25 [1] : vector<144x32xf32> to vector<144xf32>
    %37 = vector.shape_cast %36 : vector<144xf32> to vector<144x1xf32>
    %38 = vector.extract_strided_slice %37 {offsets = [0, 0], sizes = [48, 1], strides = [1, 1]} : vector<144x1xf32> to vector<48x1xf32>
    %39 = vector.extract_strided_slice %37 {offsets = [48, 0], sizes = [48, 1], strides = [1, 1]} : vector<144x1xf32> to vector<48x1xf32>
    %40 = vector.extract_strided_slice %37 {offsets = [96, 0], sizes = [48, 1], strides = [1, 1]} : vector<144x1xf32> to vector<48x1xf32>
    %41 = vector.extract_strided_slice %29 {offsets = [0, 0], sizes = [48, 1], strides = [1, 1]} : vector<144x1xf32> to vector<48x1xf32>
    %42 = vector.extract_strided_slice %29 {offsets = [48, 0], sizes = [48, 1], strides = [1, 1]} : vector<144x1xf32> to vector<48x1xf32>
    %43 = vector.extract_strided_slice %29 {offsets = [96, 0], sizes = [48, 1], strides = [1, 1]} : vector<144x1xf32> to vector<48x1xf32>
    %44 = arith.maximumf %38, %39 : vector<48x1xf32>
    %45 = arith.maximumf %44, %40 : vector<48x1xf32>
    %46 = arith.subf %38, %45 : vector<48x1xf32>
    %47 = math.exp %46 : vector<48x1xf32>
    %48 = arith.subf %39, %45 : vector<48x1xf32>
    %49 = math.exp %48 : vector<48x1xf32>
    %50 = arith.subf %40, %45 : vector<48x1xf32>
    %51 = math.exp %50 : vector<48x1xf32>
    %52 = arith.mulf %41, %47 : vector<48x1xf32>
    %53 = arith.addf %47, %49 : vector<48x1xf32>
    %54 = arith.mulf %42, %49 : vector<48x1xf32>
    %55 = arith.addf %52, %54 : vector<48x1xf32>
    %56 = arith.addf %53, %51 : vector<48x1xf32>
    %57 = arith.mulf %43, %51 : vector<48x1xf32>
    %58 = arith.addf %55, %57 : vector<48x1xf32>
    %59 = tpu.reciprocal %56 : vector<48x1xf32> -> vector<48x1xf32>
    %60 = arith.mulf %58, %59 : vector<48x1xf32>
    %61 = vector.extract_strided_slice %60 {offsets = [0, 0], sizes = [16, 1], strides = [1, 1]} : vector<48x1xf32> to vector<16x1xf32>
    %62 = vector.extract_strided_slice %60 {offsets = [16, 0], sizes = [16, 1], strides = [1, 1]} : vector<48x1xf32> to vector<16x1xf32>
    %63 = arith.addf %61, %62 : vector<16x1xf32>
    %64 = vector.extract_strided_slice %60 {offsets = [32, 0], sizes = [16, 1], strides = [1, 1]} : vector<48x1xf32> to vector<16x1xf32>
    %65 = arith.addf %63, %64 : vector<16x1xf32>
    %c0_26 = arith.constant 0 : index
    %c0_27 = arith.constant 0 : index
    %66 = vector.load %arg10[%c0_26, %c0_27] : memref<16x1xf32, #tpu.memory_space<vmem>>, vector<16x1xf32>
    tpu.vector_store %arg10[%c0_26, %c0_27], %65 {strides = array<i32>} : memref<16x1xf32, #tpu.memory_space<vmem>>, vector<16x1xf32>,
    return
  }
}

</mosaic_0001>

<bundles_post_ra>
// kernel: blade_chest_forward.1
= control target key start
LH: loop header
LB: loop body
LE: loop exit
PB: predicated region body
PF: predicated region fallthrough
CT: control target
= control target key end

     0   :  { %v2120_v0 = vmov 0   ;;  %vm348_vm0 = vcmask 1043456   ;;  %v36_v41 = vlaneseq  ;;  %vm293_vm1 = vcmask 162816   ;;  %s2833_s0 = inlined_call_operand.vmem [shape: s32[144,1], index: 0, kind: input, shape index: {}]   ;;  %s2834_s2 = inlined_call_operand.vmem [shape: f32[20,32], index: 2, kind: input, shape index: {}]   ;;  %s2835_s1 = inlined_call_operand.vmem [shape: s32[144,1], index: 1, kind: input, shape index: {}]   ;;  %s2836_s3 = inlined_call_operand.vmem [shape: f32[20,32], index: 3, kind: input, shape index: {}]   ;;  %s2837_s6 = inlined_call_operand.vmem [shape: f32[32,50], index: 6, kind: input, shape index: {}]   ;;  %s2838_s4 = inlined_call_operand.vmem [shape: f32[32,32], index: 4, kind: input, shape index: {}]   ;;  %s2839_s8 = inlined_call_operand.vmem [shape: f32[50,1], index: 8, kind: input, shape index: {}]   ;;  %s2840_s7 = inlined_call_operand.vmem [shape: f32[1,50], index: 7, kind: input, shape index: {}]   ;;  %s2841_s5 = inlined_call_operand.vmem [shape: f32[1,32], index: 5, kind: input, shape index: {}]   ;;  %s2842_s9 = inlined_call_operand.<no memory space> [shape: f32[1,1], index: 9, kind: input, shape index: {}]   ;;  %s2843_s10 = inlined_call_operand.vmem [shape: f32[16,1], index: 10, kind: output, shape index: {}]  }
   0x1   :  { %2071 = vset.pattern.permute.xlu1 %v2120_v0  ;;  %2070 = vset.pattern.permute.xlu0 %v2120_v0  ;;  %v50_v1 = vld [vmem:[%s2833_s0 + $0x60] sm:$0xff]  ;;  %v48_v2 = vld [vmem:[%s2833_s0 + $0x50] sm:$0xff]  ;;  %v51_v3 = vld [vmem:[%s2833_s0 + $0x68] sm:$0xff]  ;;  %v2121_v45 = vmov 0.0  }
   0x2   :  { %93 = vperm.xlu1 %2071, %v50_v1   ;;  %87 = vperm.xlu0 %2070, %v48_v2   ;;  %v49_v4 = vld [vmem:[%s2833_s0 + $0x58] sm:$0xff]  ;;  %v52_v6 = vld [vmem:[%s2833_s0 + $0x70] sm:$0xff]  ;;  %v55_v7 = vld [vmem:[%s2833_s0 + $0x88] sm:$0xff]  ;;  %v2305_v42 = vand.u32 127, %v36_v41 }
   0x3   :  { %v53_v5 = vld [vmem:[%s2833_s0 + $0x78] sm:$0xff]  ;;  %v54_v8 = vld [vmem:[%s2833_s0 + $0x80] sm:$0xff]  ;;  %v292_v9 = vld [vmem:[%s2834_s2 + $0x10] sm:$0xf] }
   0x4   :  { %v291_v10 = vld [vmem:[%s2834_s2 + $0x8] sm:$0xff]  ;;  %v164_v11 = vld [vmem:[%s2835_s1] sm:$0xff]  ;;  %2062 = vmatprep.subr.msk.mxu1 %vm348_vm0, %v292_v9  ;;  %1885 = vmatprep.subr.msk.mxu0 %vm348_vm0, %v292_v9  ;;  %v2229_v16 = vld [vmem:[%s2836_s3 + $0x10] sm:$0xf] }
   0x5   :  { %v38_v12 = vld [vmem:[%s2833_s0] sm:$0xff]  ;;  %2065 = vmatpush3.msk.msra.mxu1 %vm348_vm0, %v292_v9  ;;  %1886 = vmatpush3.msk.msra.mxu0 %vm348_vm0, %v292_v9  ;;  %v165_v14 = vld [vmem:[%s2835_s1 + $0x8] sm:$0xff]  ;;  %v166_v17 = vld [vmem:[%s2835_s1 + $0x10] sm:$0xff] }
   0x6   :  { %96 = vperm.xlu1 %2071, %v51_v3   ;;  %90 = vperm.xlu0 %2070, %v49_v4   ;;  %v290_v13 = vld [vmem:[%s2834_s2] sm:$0xff]  ;;  %v39_v15 = vld [vmem:[%s2833_s0 + $0x8] sm:$0xff]  ;;  %v40_v18 = vld [vmem:[%s2833_s0 + $0x10] sm:$0xff] }
   0x7   :  { %2063 = vmatprep.subr.mxu1 %v291_v10  ;;  %1887 = vmatprep.subr.mxu0 %v291_v10  ;;  %v167_v19 = vld [vmem:[%s2835_s1 + $0x18] sm:$0xff]  ;;  %v168_v21 = vld [vmem:[%s2835_s1 + $0x20] sm:$0xff]  ;;  %v169_v23 = vld [vmem:[%s2835_s1 + $0x28] sm:$0xff] }
   0x8   :  { %2066 = vmatpush3.msra.mxu1 %v291_v10  ;;  %1888 = vmatpush3.msra.mxu0 %v291_v10  ;;  %v41_v20 = vld [vmem:[%s2833_s0 + $0x18] sm:$0xff]  ;;  %v42_v22 = vld [vmem:[%s2833_s0 + $0x20] sm:$0xff]  ;;  %v43_v24 = vld [vmem:[%s2833_s0 + $0x28] sm:$0xff] }
   0x9   :  { %2064 = vmatprep.subr.mxu1 %v290_v13  ;;  %1889 = vmatprep.subr.mxu0 %v290_v13  ;;  %v170_v25 = vld [vmem:[%s2835_s1 + $0x30] sm:$0xff]  ;;  %v171_v27 = vld [vmem:[%s2835_s1 + $0x38] sm:$0xff]  ;;  %v172_v29 = vld [vmem:[%s2835_s1 + $0x40] sm:$0xff] }
   0xa   :  { %102 = vperm.xlu1 %2071, %v53_v5   ;;  %99 = vperm.xlu0 %2070, %v52_v6   ;;  %v44_v26 = vld [vmem:[%s2833_s0 + $0x30] sm:$0xff]  ;;  %v45_v28 = vld [vmem:[%s2833_s0 + $0x38] sm:$0xff]  ;;  %v46_v30 = vld [vmem:[%s2833_s0 + $0x40] sm:$0xff] }
   0xb   :  { %2067 = vmatpush3.msra.mxu1 %v290_v13  ;;  %1890 = vmatpush3.msra.mxu0 %v290_v13  ;;  %v173_v31 = vld [vmem:[%s2835_s1 + $0x48] sm:$0xff]  ;;  %v175_v33 = vld [vmem:[%s2835_s1 + $0x58] sm:$0xff]  ;;  %v174_v34 = vld [vmem:[%s2835_s1 + $0x50] sm:$0xff] }
   0xc   :  { %1918 = vmatprep.subr.msk.mxu1 %vm348_vm0, %v2229_v16  ;;  %v47_v32 = vld [vmem:[%s2833_s0 + $0x48] sm:$0xff]  ;;  %v176_v36 = vld [vmem:[%s2835_s1 + $0x60] sm:$0xff]  ;;  %v179_v37 = vld [vmem:[%s2835_s1 + $0x78] sm:$0xff] }
   0xd   :  { %v177_v35 = vld [vmem:[%s2835_s1 + $0x68] sm:$0xff]  ;;  %v178_v38 = vld [vmem:[%s2835_s1 + $0x70] sm:$0xff]  ;;  %v180_v40 = vld [vmem:[%s2835_s1 + $0x80] sm:$0xff] }
   0xe   :  { %108 = vperm.xlu1 %2071, %v55_v7   ;;  %105 = vperm.xlu0 %2070, %v54_v8   ;;  %v181_v39 = vld [vmem:[%s2835_s1 + $0x88] sm:$0xff]  ;;  %v507_v54 = vld [vmem:[%s2836_s3] sm:$0xff] }
   0xf   :  { %v508_v50 = vld [vmem:[%s2836_s3 + $0x8] sm:$0xff] }
  0x12   :  { %183 = vperm.xlu1 %2071, %v164_v11   ;;  %57 = vperm.xlu0 %2070, %v38_v12  }
  0x16   :  { %186 = vperm.xlu1 %2071, %v165_v14   ;;  %60 = vperm.xlu0 %2070, %v39_v15  }
  0x1a   :  { %189 = vperm.xlu1 %2071, %v166_v17   ;;  %63 = vperm.xlu0 %2070, %v40_v18  }
  0x1e   :  { %192 = vperm.xlu1 %2071, %v167_v19   ;;  %66 = vperm.xlu0 %2070, %v41_v20  }
  0x22   :  { %195 = vperm.xlu1 %2071, %v168_v21   ;;  %69 = vperm.xlu0 %2070, %v42_v22  }
  0x26   :  { %198 = vperm.xlu1 %2071, %v169_v23   ;;  %72 = vperm.xlu0 %2070, %v43_v24  }
  0x2a   :  { %201 = vperm.xlu1 %2071, %v170_v25   ;;  %75 = vperm.xlu0 %2070, %v44_v26  }
  0x2e   :  { %204 = vperm.xlu1 %2071, %v171_v27   ;;  %78 = vperm.xlu0 %2070, %v45_v28  }
  0x32   :  { %207 = vperm.xlu1 %2071, %v172_v29   ;;  %81 = vperm.xlu0 %2070, %v46_v30  }
  0x36   :  { %210 = vperm.xlu1 %2071, %v173_v31   ;;  %84 = vperm.xlu0 %2070, %v47_v32  }
  0x3a   :  { %216 = vperm.xlu1 %2071, %v175_v33   ;;  %213 = vperm.xlu0 %2070, %v174_v34  }
  0x3e   :  { %222 = vperm.xlu1 %2071, %v177_v35   ;;  %219 = vperm.xlu0 %2070, %v176_v36  }
  0x42   :  { %228 = vperm.xlu1 %2071, %v179_v37   ;;  %225 = vperm.xlu0 %2070, %v178_v38  }
  0x46   :  { %234 = vperm.xlu1 %2071, %v181_v39   ;;  %231 = vperm.xlu0 %2070, %v180_v40  }
  0x7d   :  { %v94_v43 = vpop.permute.xlu1 %93  ;;  %v88_v44 = vpop.permute.xlu0 %87 }
  0x7e   :  { %vm120_vm2 = vcmp.eq.s32.totalorder %v88_v44, %v2305_v42  ;;  %vm122_vm3 = vcmp.eq.s32.totalorder %v94_v43, %v2305_v42 }
  0x7f   :  { %v1653_v46 = vsel %vm120_vm2, 1.0, %v2121_v45  ;;  %v1655_v51 = vsel %vm122_vm3, 1.0, %v2121_v45 }
  0x80   :  { %1906 = vmatprep.mubr.msk.f32.mxu1 %vm293_vm1, %v1653_v46 }
  0x81   :  { %v97_v47 = vpop.permute.xlu1 %96  ;;  %v91_v48 = vpop.permute.xlu0 %90 }
  0x82   :  { %vm121_vm4 = vcmp.eq.s32.totalorder %v91_v48, %v2305_v42  ;;  %vm123_vm5 = vcmp.eq.s32.totalorder %v97_v47, %v2305_v42 }
  0x83   :  { %v1654_v49 = vsel %vm121_vm4, 1.0, %v2121_v45  ;;  %v1656_v55 = vsel %vm123_vm5, 1.0, %v2121_v45 }
  0x84   :  { %1907 = vmatmul.mubr.msk.f32.vlgmr.msra.gmra.mxu1 %vm293_vm1, %v1654_v49 }
  0x85   :  { %v103_v52 = vpop.permute.xlu1 %102  ;;  %1909 = vmatprep.mubr.msk.f32.mxu1 %vm293_vm1, %v1655_v51  ;;  %v100_v53 = vpop.permute.xlu0 %99  ;;  %1919 = vmatpush3.msk.msra.mxu1 %vm348_vm0, %v2229_v16 }
  0x86   :  { %vm124_vm6 = vcmp.eq.s32.totalorder %v100_v53, %v2305_v42  ;;  %1920 = vmatprep.subr.mxu1 %v508_v50  ;;  %vm125_vm7 = vcmp.eq.s32.totalorder %v103_v52, %v2305_v42 }
  0x87   :  { %v1657_v56 = vsel %vm124_vm6, 1.0, %v2121_v45  ;;  %1921 = vmatpush3.msra.mxu1 %v508_v50  ;;  %v1658_v59 = vsel %vm125_vm7, 1.0, %v2121_v45 }
  0x88   :  { %1910 = vmatmul.mubr.msk.f32.gmra.mxu1 %vm293_vm1, %v1656_v55  ;;  %1922 = vmatprep.subr.mxu1 %v507_v54 }
  0x89   :  { %v109_v57 = vpop.permute.xlu1 %108  ;;  %1912 = vmatprep.mubr.msk.f32.mxu1 %vm293_vm1, %v1657_v56  ;;  %v106_v58 = vpop.permute.xlu0 %105  ;;  %1923 = vmatpush3.msra.mxu1 %v507_v54  ;;  %v743_v56 = vld [vmem:[%s2837_s6 + $0x18] sm:$0xff] }
  0x8a   :  { %vm126_vm8 = vcmp.eq.s32.totalorder %v106_v58, %v2305_v42  ;;  %vm127_vm9 = vcmp.eq.s32.totalorder %v109_v57, %v2305_v42  ;;  %1951 = vmatprep.subr.mxu0 %v743_v56  ;;  %v742_v57 = vld [vmem:[%s2837_s6 + $0x10] sm:$0xff]  ;;  %v1223_v58 = vld [vmem:[%s2838_s4 + $0x18] sm:$0xff] }
  0x8b   :  { %v1659_v60 = vsel %vm126_vm8, 1.0, %v2121_v45  ;;  %v1660_v63 = vsel %vm127_vm9, 1.0, %v2121_v45 }
  0x8c   :  { %1913 = vmatmul.mubr.msk.f32.gmra.mxu1 %vm293_vm1, %v1658_v59  ;;  %v985_v59 = vld [vmem:[%s2839_s8 + $0x30] sm:$0x3] }
  0x8d   :  { %v184_v61 = vpop.permute.xlu1 %183  ;;  %1915 = vmatprep.mubr.msk.f32.mxu1 %vm293_vm1, %v1659_v60  ;;  %v58_v62 = vpop.permute.xlu0 %57  ;;  %v984_v60 = vld [vmem:[%s2839_s8 + $0x28] sm:$0xff] }
  0x8e   :  { %vm236_vm10 = vcmp.eq.s32.totalorder %v184_v61, %v2305_v42  ;;  %vm110_vm11 = vcmp.eq.s32.totalorder %v58_v62, %v2305_v42  ;;  %v983_v61 = vld [vmem:[%s2839_s8 + $0x20] sm:$0xff] }
  0x8f   :  { %v1661_v0 = vsel %vm236_vm10, 1.0, %v2121_v45  ;;  %v1643_v1 = vsel %vm110_vm11, 1.0, %v2121_v45 }
  0x90   :  { %1891 = vmatprep.mubr.msk.f32.mxu0 %vm293_vm1, %v1643_v1  ;;  %1916 = vmatmul.mubr.msk.f32.gmra.mxu1 %vm293_vm1, %v1660_v63 }
  0x91   :  { %v187_v2 = vpop.permute.xlu1 %186  ;;  %1924 = vmatprep.mubr.msk.f32.mxu1 %vm293_vm1, %v1661_v0  ;;  %v61_v3 = vpop.permute.xlu0 %60 }
  0x92   :  { %vm237_vm12 = vcmp.eq.s32.totalorder %v187_v2, %v2305_v42  ;;  %vm111_vm13 = vcmp.eq.s32.totalorder %v61_v3, %v2305_v42 }
  0x93   :  { %v1662_v4 = vsel %vm237_vm12, 1.0, %v2121_v45  ;;  %v1644_v5 = vsel %vm111_vm13, 1.0, %v2121_v45 }
  0x94   :  { %1892 = vmatmul.mubr.msk.f32.vlgmr.msra.gmra.mxu0 %vm293_vm1, %v1644_v5  ;;  %1925 = vmatmul.mubr.msk.f32.vlgmr.msra.gmra.mxu1 %vm293_vm1, %v1662_v4 }
  0x95   :  { %v190_v6 = vpop.permute.xlu1 %189  ;;  %v64_v7 = vpop.permute.xlu0 %63  ;;  %1952 = vmatpush3.msra.mxu0 %v743_v56 }
  0x96   :  { %vm238_vm14 = vcmp.eq.s32.totalorder %v190_v6, %v2305_v42  ;;  %vm112_vm15 = vcmp.eq.s32.totalorder %v64_v7, %v2305_v42  ;;  %1953 = vmatprep.subr.mxu0 %v742_v57 }
  0x97   :  { %v1663_v8 = vsel %vm238_vm14, 1.0, %v2121_v45  ;;  %v1645_v9 = vsel %vm112_vm15, 1.0, %v2121_v45  ;;  %1954 = vmatpush3.msra.mxu0 %v742_v57  ;;  %v982_v57 = vld [vmem:[%s2839_s8 + $0x18] sm:$0xff] }
  0x98   :  { %1894 = vmatprep.mubr.msk.f32.mxu0 %vm293_vm1, %v1645_v9  ;;  %1927 = vmatprep.mubr.msk.f32.mxu1 %vm293_vm1, %v1663_v8 }
  0x99   :  { %v193_v10 = vpop.permute.xlu1 %192  ;;  %v67_v11 = vpop.permute.xlu0 %66 }
  0x9a   :  { %vm239_vm0 = vcmp.eq.s32.totalorder %v193_v10, %v2305_v42  ;;  %vm113_vm2 = vcmp.eq.s32.totalorder %v67_v11, %v2305_v42 }
  0x9b   :  { %v1664_v12 = vsel %vm239_vm0, 1.0, %v2121_v45  ;;  %v1646_v13 = vsel %vm113_vm2, 1.0, %v2121_v45 }
  0x9c   :  { %1895 = vmatmul.mubr.msk.f32.gmra.mxu0 %vm293_vm1, %v1646_v13  ;;  %1928 = vmatmul.mubr.msk.f32.gmra.mxu1 %vm293_vm1, %v1664_v12  ;;  %v1222_v12 = vld [vmem:[%s2838_s4 + $0x10] sm:$0xff]  ;;  %v1221_v13 = vld [vmem:[%s2838_s4 + $0x8] sm:$0xff] }
  0x9d   :  { %v196_v14 = vpop.permute.xlu1 %195  ;;  %v70_v15 = vpop.permute.xlu0 %69 }
  0x9e   :  { %vm240_vm3 = vcmp.eq.s32.totalorder %v196_v14, %v2305_v42  ;;  %vm114_vm4 = vcmp.eq.s32.totalorder %v70_v15, %v2305_v42 }
  0x9f   :  { %v1665_v16 = vsel %vm240_vm3, 1.0, %v2121_v45  ;;  %v1647_v17 = vsel %vm114_vm4, 1.0, %v2121_v45 }
  0xa0   :  { %1897 = vmatprep.mubr.msk.f32.mxu0 %vm293_vm1, %v1647_v17  ;;  %1930 = vmatprep.mubr.msk.f32.mxu1 %vm293_vm1, %v1665_v16  ;;  %v1220_v16 = vld [vmem:[%s2838_s4] sm:$0xff] }
  0xa1   :  { %v199_v18 = vpop.permute.xlu1 %198  ;;  %v73_v19 = vpop.permute.xlu0 %72 }
  0xa2   :  { %vm241_vm5 = vcmp.eq.s32.totalorder %v199_v18, %v2305_v42  ;;  %vm115_vm6 = vcmp.eq.s32.totalorder %v73_v19, %v2305_v42 }
  0xa3   :  { %v1666_v20 = vsel %vm241_vm5, 1.0, %v2121_v45  ;;  %v1648_v21 = vsel %vm115_vm6, 1.0, %v2121_v45 }
  0xa4   :  { %1898 = vmatmul.mubr.msk.f32.gmra.mxu0 %vm293_vm1, %v1648_v21  ;;  %1931 = vmatmul.mubr.msk.f32.gmra.mxu1 %vm293_vm1, %v1666_v20 }
  0xa5   :  { %v202_v22 = vpop.permute.xlu1 %201  ;;  %v76_v23 = vpop.permute.xlu0 %75 }
  0xa6   :  { %vm242_vm7 = vcmp.eq.s32.totalorder %v202_v22, %v2305_v42  ;;  %vm116_vm8 = vcmp.eq.s32.totalorder %v76_v23, %v2305_v42 }
  0xa7   :  { %v1667_v24 = vsel %vm242_vm7, 1.0, %v2121_v45  ;;  %v1649_v25 = vsel %vm116_vm8, 1.0, %v2121_v45  ;;  %vm751_vm8 = vcmask 261120  }
  0xa8   :  { %1900 = vmatprep.mubr.msk.f32.mxu0 %vm293_vm1, %v1649_v25  ;;  %1933 = vmatprep.mubr.msk.f32.mxu1 %vm293_vm1, %v1667_v24 }
  0xa9   :  { %v205_v26 = vpop.permute.xlu1 %204  ;;  %v79_v27 = vpop.permute.xlu0 %78 }
  0xaa   :  { %vm243_vm9 = vcmp.eq.s32.totalorder %v205_v26, %v2305_v42  ;;  %vm117_vm10 = vcmp.eq.s32.totalorder %v79_v27, %v2305_v42 }
  0xab   :  { %v1668_v28 = vsel %vm243_vm9, 1.0, %v2121_v45  ;;  %v1650_v29 = vsel %vm117_vm10, 1.0, %v2121_v45  ;;  %vm988_vm9 = vcmask 408576   ;;  %vm1636_vm10 = vcmask 7168  }
  0xac   :  { %1901 = vmatmul.mubr.msk.f32.gmra.mxu0 %vm293_vm1, %v1650_v29  ;;  %1934 = vmatmul.mubr.msk.f32.gmra.mxu1 %vm293_vm1, %v1668_v28 }
  0xad   :  { %v208_v30 = vpop.permute.xlu1 %207  ;;  %v82_v31 = vpop.permute.xlu0 %81 }
  0xae   :  { %vm244_vm11 = vcmp.eq.s32.totalorder %v208_v30, %v2305_v42  ;;  %vm118_vm12 = vcmp.eq.s32.totalorder %v82_v31, %v2305_v42 }
  0xaf   :  { %v1669_v32 = vsel %vm244_vm11, 1.0, %v2121_v45  ;;  %v1651_v33 = vsel %vm118_vm12, 1.0, %v2121_v45 }
  0xb0   :  { %1903 = vmatprep.mubr.msk.f32.mxu0 %vm293_vm1, %v1651_v33  ;;  %1936 = vmatprep.mubr.msk.f32.mxu1 %vm293_vm1, %v1669_v32 }
  0xb1   :  { %v211_v34 = vpop.permute.xlu1 %210  ;;  %v85_v35 = vpop.permute.xlu0 %84 }
  0xb2   :  { %vm245_vm13 = vcmp.eq.s32.totalorder %v211_v34, %v2305_v42  ;;  %vm119_vm14 = vcmp.eq.s32.totalorder %v85_v35, %v2305_v42 }
  0xb3   :  { %v1670_v36 = vsel %vm245_vm13, 1.0, %v2121_v45  ;;  %v1652_v37 = vsel %vm119_vm14, 1.0, %v2121_v45 }
  0xb4   :  { %1904 = vmatmul.mubr.msk.f32.gmra.mxu0 %vm293_vm1, %v1652_v37  ;;  %1937 = vmatmul.mubr.msk.f32.gmra.mxu1 %vm293_vm1, %v1670_v36 }
  0xb5   :  { %v217_v38 = vpop.permute.xlu1 %216  ;;  %v214_v39 = vpop.permute.xlu0 %213 }
  0xb6   :  { %vm247_vm15 = vcmp.eq.s32.totalorder %v217_v38, %v2305_v42  ;;  %vm246_vm0 = vcmp.eq.s32.totalorder %v214_v39, %v2305_v42 }
  0xb7   :  { %v1672_v40 = vsel %vm247_vm15, 1.0, %v2121_v45  ;;  %v1671_v41 = vsel %vm246_vm0, 1.0, %v2121_v45 }
  0xb8   :  { %1939 = vmatprep.mubr.msk.f32.mxu1 %vm293_vm1, %v1671_v41 }
  0xb9   :  { %v223_v43 = vpop.permute.xlu1 %222  ;;  %1940 = vmatmul.mubr.msk.f32.gmra.mxu1 %vm293_vm1, %v1672_v40  ;;  %v220_v44 = vpop.permute.xlu0 %219 }
  0xba   :  { %vm249_vm2 = vcmp.eq.s32.totalorder %v223_v43, %v2305_v42  ;;  %vm248_vm3 = vcmp.eq.s32.totalorder %v220_v44, %v2305_v42 }
  0xbb   :  { %v1674_v46 = vsel %vm249_vm2, 1.0, %v2121_v45  ;;  %v1673_v47 = vsel %vm248_vm3, 1.0, %v2121_v45 }
  0xbc   :  { %1942 = vmatprep.mubr.msk.f32.mxu1 %vm293_vm1, %v1673_v47 }
  0xbd   :  { %v229_v48 = vpop.permute.xlu1 %228  ;;  %1943 = vmatmul.mubr.msk.f32.gmra.mxu1 %vm293_vm1, %v1674_v46  ;;  %v226_v49 = vpop.permute.xlu0 %225 }
  0xbe   :  { %vm251_vm4 = vcmp.eq.s32.totalorder %v229_v48, %v2305_v42  ;;  %vm250_vm5 = vcmp.eq.s32.totalorder %v226_v49, %v2305_v42 }
  0xbf   :  { %v1676_v50 = vsel %vm251_vm4, 1.0, %v2121_v45  ;;  %v1675_v51 = vsel %vm250_vm5, 1.0, %v2121_v45 }
  0xc0   :  { %1945 = vmatprep.mubr.msk.f32.mxu1 %vm293_vm1, %v1675_v51 }
  0xc1   :  { %v235_v52 = vpop.permute.xlu1 %234  ;;  %1946 = vmatmul.mubr.msk.f32.gmra.mxu1 %vm293_vm1, %v1676_v50  ;;  %v232_v53 = vpop.permute.xlu0 %231 }
  0xc2   :  { %vm253_vm6 = vcmp.eq.s32.totalorder %v235_v52, %v2305_v42  ;;  %vm252_vm7 = vcmp.eq.s32.totalorder %v232_v53, %v2305_v42  ;;  %v741_v42 = vld [vmem:[%s2837_s6 + $0x8] sm:$0xff] }
  0xc3   :  { %v1678_v54 = vsel %vm253_vm6, 1.0, %v2121_v45  ;;  %v1677_v55 = vsel %vm252_vm7, 1.0, %v2121_v45  ;;  %1955 = vmatprep.subr.mxu0 %v741_v42  ;;  %v740_v45 = vld [vmem:[%s2837_s6] sm:$0xff] }
  0xc4   :  { %1948 = vmatprep.mubr.msk.f32.mxu1 %vm293_vm1, %v1677_v55  ;;  %1956 = vmatpush3.msra.mxu0 %v741_v42  ;;  %v981_v42 = vld [vmem:[%s2839_s8 + $0x10] sm:$0xff] }
  0xc5   :  { %1949 = vmatmul.mubr.msk.f32.gmra.mxu1 %vm293_vm1, %v1678_v54  ;;  %1957 = vmatprep.subr.mxu0 %v740_v45  ;;  %vm1043_vm1 = vcmask 1041408  }
  0xc6   :  { %1958 = vmatpush3.msra.mxu0 %v740_v45  ;;  %1986 = vmatprep.subr.msk.mxu1 %vm1043_vm1, %v985_v59  ;;  %v980_v45 = vld [vmem:[%s2839_s8 + $0x8] sm:$0xff] }
  0xc7   :  { %2027 = vmatprep.subr.mxu0 %v1223_v58  ;;  %1987 = vmatpush3.msk.msra.mxu1 %vm1043_vm1, %v985_v59  ;;  %v2605_v59 = vld [vmem:[%s2840_s7] ss:$0 sm:$0xff] }
  0xc8   :  { %1988 = vmatprep.subr.mxu1 %v984_v60 }
  0xc9   :  { %1989 = vmatpush3.msra.mxu1 %v984_v60 }
  0xca   :  { %1990 = vmatprep.subr.mxu1 %v983_v61 }
  0xcb   :  { %1991 = vmatpush3.msra.mxu1 %v983_v61 }
  0xcc   :  { %1992 = vmatprep.subr.mxu1 %v982_v57 }
  0xcd   :  { %1993 = vmatpush3.msra.mxu1 %v982_v57 }
  0xce   :  { %1994 = vmatprep.subr.mxu1 %v981_v42 }
  0xcf   :  { %1995 = vmatpush3.msra.mxu1 %v981_v42 }
  0xd0   :  { %1996 = vmatprep.subr.mxu1 %v980_v45 }
  0xd1   :  { %1997 = vmatpush3.msra.mxu1 %v980_v45 }
 0x144   :  { %v2447_v62 = vpop.f32.mrf.mxu1 }
 0x146   :  { %v2449_v63 = vpop.f32.mrf.mxu1 }
 0x148   :  { %v2451_v0 = vpop.f32.mrf.mxu1 }
 0x14a   :  { %v2453_v1 = vpop.f32.mrf.mxu1 }
 0x14c   :  { %v2455_v2 = vpop.f32.mrf.mxu1 }
 0x14e   :  { %v2457_v3 = vpop.f32.mrf.mxu1 }
 0x150   :  { %v2459_v4 = vpop.f32.mrf.mxu1 }
 0x152   :  { %v2461_v5 = vpop.f32.mrf.mxu1 }
 0x154   :  { %v2463_v6 = vpop.f32.mrf.mxu0  ;;  %v2465_v7 = vpop.f32.mrf.mxu1 }
 0x155   :  { %v723_v11 = vmul.f32 %v2465_v7, %v2463_v6 }
 0x156   :  { %v2467_v8 = vpop.f32.mrf.mxu0  ;;  %v2469_v9 = vpop.f32.mrf.mxu1 }
 0x157   :  { %v722_v10 = vmul.f32 %v2469_v9, %v2467_v8 }
 0x159   :  { %1959 = vmatprep.mubr.msk.f32.mxu0 %vm751_vm8, %v722_v10 }
 0x15a   :  { %1960 = vmatmul.mubr.msk.f32.vlgmr.msra.gmra.mxu0 %vm751_vm8, %v723_v11 }
 0x15b   :  { %2028 = vmatpush3.msra.mxu0 %v1223_v58  ;;  %v979_v58 = vld [vmem:[%s2839_s8] sm:$0xff] }
 0x15c   :  { %v2483_v14 = vpop.f32.mrf.mxu0  ;;  %v2485_v15 = vpop.f32.mrf.mxu1  ;;  %2029 = vmatprep.subr.mxu0 %v1222_v12  ;;  %1998 = vmatprep.subr.mxu1 %v979_v58 }
 0x15d   :  { %2030 = vmatpush3.msra.mxu0 %v1222_v12  ;;  %v725_v20 = vmul.f32 %v2485_v15, %v2483_v14  ;;  %1999 = vmatpush3.msra.mxu1 %v979_v58 }
 0x15e   :  { %v428_v17 = vpop.f32.mrf.mxu0  ;;  %v2490_v18 = vpop.f32.mrf.mxu1  ;;  %2031 = vmatprep.subr.mxu0 %v1221_v13 }
 0x15f   :  { %v724_v19 = vmul.f32 %v2490_v18, %v428_v17  ;;  %2032 = vmatpush3.msra.mxu0 %v1221_v13 }
 0x160   :  { %2033 = vmatprep.subr.mxu0 %v1220_v16 }
 0x161   :  { %1962 = vmatprep.mubr.msk.f32.mxu0 %vm751_vm8, %v724_v19  ;;  %2034 = vmatpush3.msra.mxu0 %v1220_v16 }
 0x162   :  { %1963 = vmatmul.mubr.msk.f32.gmra.mxu0 %vm751_vm8, %v725_v20 }
 0x164   :  { %v1899_v21 = vpop.f32.mrf.mxu0  ;;  %v2497_v22 = vpop.f32.mrf.mxu1 }
 0x165   :  { %v727_v26 = vmul.f32 %v2497_v22, %v1899_v21 }
 0x166   :  { %v438_v23 = vpop.f32.mrf.mxu0  ;;  %v2499_v24 = vpop.f32.mrf.mxu1 }
 0x167   :  { %v726_v25 = vmul.f32 %v2499_v24, %v438_v23 }
 0x169   :  { %1965 = vmatprep.mubr.msk.f32.mxu0 %vm751_vm8, %v726_v25 }
 0x16a   :  { %1966 = vmatmul.mubr.msk.f32.gmra.mxu0 %vm751_vm8, %v727_v26 }
 0x16c   :  { %v1902_v27 = vpop.f32.mrf.mxu0  ;;  %v2505_v28 = vpop.f32.mrf.mxu1 }
 0x16d   :  { %v729_v32 = vmul.f32 %v2505_v28, %v1902_v27 }
 0x16e   :  { %v448_v29 = vpop.f32.mrf.mxu0  ;;  %v2507_v30 = vpop.f32.mrf.mxu1 }
 0x16f   :  { %v728_v31 = vmul.f32 %v2507_v30, %v448_v29 }
 0x171   :  { %1968 = vmatprep.mubr.msk.f32.mxu0 %vm751_vm8, %v728_v31 }
 0x172   :  { %1969 = vmatmul.mubr.msk.f32.gmra.mxu0 %vm751_vm8, %v729_v32 }
 0x174   :  { %v1905_v33 = vpop.f32.mrf.mxu0  ;;  %v2513_v34 = vpop.f32.mrf.mxu1 }
 0x175   :  { %v731_v38 = vmul.f32 %v2513_v34, %v1905_v33 }
 0x176   :  { %v458_v35 = vpop.f32.mrf.mxu0  ;;  %v2515_v36 = vpop.f32.mrf.mxu1 }
 0x177   :  { %v730_v37 = vmul.f32 %v2515_v36, %v458_v35 }
 0x179   :  { %v2519_v39 = vpop.f32.mrf.mxu1  ;;  %1971 = vmatprep.mubr.msk.f32.mxu0 %vm751_vm8, %v730_v37 }
 0x17a   :  { %1972 = vmatmul.mubr.msk.f32.gmra.mxu0 %vm751_vm8, %v731_v38  ;;  %v733_v43 = vmul.f32 %v2519_v39, %v2447_v62 }
 0x17b   :  { %v2523_v40 = vpop.f32.mrf.mxu1 }
 0x17c   :  { %v732_v41 = vmul.f32 %v2523_v40, %v2449_v63 }
 0x17d   :  { %v2529_v44 = vpop.f32.mrf.mxu1 }
 0x17e   :  { %1974 = vmatprep.mubr.msk.f32.mxu0 %vm751_vm8, %v732_v41  ;;  %v735_v48 = vmul.f32 %v2529_v44, %v2451_v0 }
 0x17f   :  { %v2532_v46 = vpop.f32.mrf.mxu1  ;;  %1975 = vmatmul.mubr.msk.f32.gmra.mxu0 %vm751_vm8, %v733_v43 }
 0x180   :  { %v734_v47 = vmul.f32 %v2532_v46, %v2453_v1 }
 0x181   :  { %v2539_v49 = vpop.f32.mrf.mxu1 }
 0x182   :  { %1977 = vmatprep.mubr.msk.f32.mxu0 %vm751_vm8, %v734_v47  ;;  %v737_v52 = vmul.f32 %v2539_v49, %v2455_v2 }
 0x183   :  { %v2542_v50 = vpop.f32.mrf.mxu1  ;;  %1978 = vmatmul.mubr.msk.f32.gmra.mxu0 %vm751_vm8, %v735_v48 }
 0x184   :  { %v736_v51 = vmul.f32 %v2542_v50, %v2457_v3 }
 0x185   :  { %v2549_v53 = vpop.f32.mrf.mxu1 }
 0x186   :  { %1980 = vmatprep.mubr.msk.f32.mxu0 %vm751_vm8, %v736_v51  ;;  %v739_v56 = vmul.f32 %v2549_v53, %v2459_v4 }
 0x187   :  { %v2552_v54 = vpop.f32.mrf.mxu1  ;;  %1981 = vmatmul.mubr.msk.f32.gmra.mxu0 %vm751_vm8, %v737_v52 }
 0x188   :  { %v738_v55 = vmul.f32 %v2552_v54, %v2461_v5 }
 0x18a   :  { %1983 = vmatprep.mubr.msk.f32.mxu0 %vm751_vm8, %v738_v55 }
 0x18b   :  { %1984 = vmatmul.mubr.msk.f32.gmra.mxu0 %vm751_vm8, %v739_v56 }
 0x18c   :  { %2035 = vmatprep.mubr.msk.f32.mxu0 %vm751_vm8, %v2467_v8 }
 0x18f   :  { %2036 = vmatmul.mubr.msk.f32.vlgmr.msra.gmra.mxu0 %vm751_vm8, %v2463_v6 }
 0x190   :  { %2038 = vmatprep.mubr.msk.f32.mxu0 %vm751_vm8, %v428_v17 }
 0x193   :  { %2039 = vmatmul.mubr.msk.f32.gmra.mxu0 %vm751_vm8, %v2483_v14 }
 0x194   :  { %2041 = vmatprep.mubr.msk.f32.mxu0 %vm751_vm8, %v438_v23 }
 0x197   :  { %2042 = vmatmul.mubr.msk.f32.gmra.mxu0 %vm751_vm8, %v1899_v21 }
 0x198   :  { %2044 = vmatprep.mubr.msk.f32.mxu0 %vm751_vm8, %v448_v29 }
 0x19b   :  { %2045 = vmatmul.mubr.msk.f32.gmra.mxu0 %vm751_vm8, %v1902_v27 }
 0x19c   :  { %2047 = vmatprep.mubr.msk.f32.mxu0 %vm751_vm8, %v458_v35 }
 0x19f   :  { %2048 = vmatmul.mubr.msk.f32.gmra.mxu0 %vm751_vm8, %v1905_v33 }
 0x1a0   :  { %2050 = vmatprep.mubr.msk.f32.mxu0 %vm751_vm8, %v2449_v63 }
 0x1a3   :  { %2051 = vmatmul.mubr.msk.f32.gmra.mxu0 %vm751_vm8, %v2447_v62 }
 0x1a4   :  { %2053 = vmatprep.mubr.msk.f32.mxu0 %vm751_vm8, %v2453_v1 }
 0x1a7   :  { %2054 = vmatmul.mubr.msk.f32.gmra.mxu0 %vm751_vm8, %v2451_v0 }
 0x1a8   :  { %2056 = vmatprep.mubr.msk.f32.mxu0 %vm751_vm8, %v2457_v3 }
 0x1ab   :  { %2057 = vmatmul.mubr.msk.f32.gmra.mxu0 %vm751_vm8, %v2455_v2 }
 0x1ac   :  { %2059 = vmatprep.mubr.msk.f32.mxu0 %vm751_vm8, %v2461_v5 }
 0x1af   :  { %2060 = vmatmul.mubr.msk.f32.gmra.mxu0 %vm751_vm8, %v2459_v4 }
 0x21a   :  { %v1961_v60 = vpop.f32.mrf.mxu0 }
 0x21b   :  { %v878_v61 = vadd.f32 %v1961_v60, %v2605_v59 }
 0x21c   :  { %v872_v62 = vpop.f32.mrf.mxu0 }
 0x21d   :  { %v873_v63 = vadd.f32 %v2605_v59, %v872_v62  ;;  %v962_v1 = vmax.f32 %v878_v61, 0.0 }
 0x21f   :  { %v961_v0 = vmax.f32 %v873_v63, 0.0 }
 0x221   :  { %2000 = vmatprep.mubr.msk.f32.mxu1 %vm988_vm9, %v961_v0 }
 0x222   :  { %v1964_v2 = vpop.f32.mrf.mxu0  ;;  %2001 = vmatmul.mubr.msk.f32.vlgmr.msra.gmra.mxu1 %vm988_vm9, %v962_v1 }
 0x223   :  { %v888_v3 = vadd.f32 %v1964_v2, %v2605_v59  ;;  %v2641_v2 = vld [vmem:[%s2841_s5] ss:$0 sm:$0xff] }
 0x224   :  { %v882_v4 = vpop.f32.mrf.mxu0 }
 0x225   :  { %v883_v5 = vadd.f32 %v2605_v59, %v882_v4  ;;  %v964_v8 = vmax.f32 %v888_v3, 0.0 }
 0x227   :  { %v963_v6 = vmax.f32 %v883_v5, 0.0 }
 0x229   :  { %2003 = vmatprep.mubr.msk.f32.mxu1 %vm988_vm9, %v963_v6 }
 0x22a   :  { %v1967_v10 = vpop.f32.mrf.mxu0  ;;  %2004 = vmatmul.mubr.msk.f32.gmra.mxu1 %vm988_vm9, %v964_v8 }
 0x22b   :  { %v898_v11 = vadd.f32 %v1967_v10, %v2605_v59 }
 0x22c   :  { %v892_v12 = vpop.f32.mrf.mxu0 }
 0x22d   :  { %v893_v13 = vadd.f32 %v2605_v59, %v892_v12  ;;  %v966_v16 = vmax.f32 %v898_v11, 0.0 }
 0x22f   :  { %v965_v14 = vmax.f32 %v893_v13, 0.0 }
 0x231   :  { %2006 = vmatprep.mubr.msk.f32.mxu1 %vm988_vm9, %v965_v14 }
 0x232   :  { %v1970_v17 = vpop.f32.mrf.mxu0  ;;  %2007 = vmatmul.mubr.msk.f32.gmra.mxu1 %vm988_vm9, %v966_v16 }
 0x233   :  { %v908_v19 = vadd.f32 %v1970_v17, %v2605_v59 }
 0x234   :  { %v902_v20 = vpop.f32.mrf.mxu0 }
 0x235   :  { %v903_v21 = vadd.f32 %v2605_v59, %v902_v20  ;;  %v968_v25 = vmax.f32 %v908_v19, 0.0 }
 0x237   :  { %v967_v23 = vmax.f32 %v903_v21, 0.0 }
 0x239   :  { %2009 = vmatprep.mubr.msk.f32.mxu1 %vm988_vm9, %v967_v23 }
 0x23a   :  { %v1973_v26 = vpop.f32.mrf.mxu0  ;;  %2010 = vmatmul.mubr.msk.f32.gmra.mxu1 %vm988_vm9, %v968_v25 }
 0x23b   :  { %v918_v27 = vadd.f32 %v1973_v26, %v2605_v59 }
 0x23c   :  { %v912_v29 = vpop.f32.mrf.mxu0 }
 0x23d   :  { %v913_v31 = vadd.f32 %v2605_v59, %v912_v29  ;;  %v970_v35 = vmax.f32 %v918_v27, 0.0 }
 0x23f   :  { %v969_v32 = vmax.f32 %v913_v31, 0.0  ;;  %v1976_v33 = vpop.f32.mrf.mxu0 }
 0x240   :  { %v928_v37 = vadd.f32 %v1976_v33, %v2605_v59 }
 0x241   :  { %v922_v38 = vpop.f32.mrf.mxu0  ;;  %2012 = vmatprep.mubr.msk.f32.mxu1 %vm988_vm9, %v969_v32 }
 0x242   :  { %v923_v41 = vadd.f32 %v2605_v59, %v922_v38  ;;  %2013 = vmatmul.mubr.msk.f32.gmra.mxu1 %vm988_vm9, %v970_v35  ;;  %v972_v48 = vmax.f32 %v928_v37, 0.0 }
 0x243   :  { %v1979_v43 = vpop.f32.mrf.mxu0 }
 0x244   :  { %v971_v47 = vmax.f32 %v923_v41, 0.0  ;;  %v938_v51 = vadd.f32 %v1979_v43, %v2605_v59 }
 0x245   :  { %v932_v52 = vpop.f32.mrf.mxu0 }
 0x246   :  { %v933_v55 = vadd.f32 %v2605_v59, %v932_v52  ;;  %2015 = vmatprep.mubr.msk.f32.mxu1 %vm988_vm9, %v971_v47  ;;  %v974_v42 = vmax.f32 %v938_v51, 0.0 }
 0x247   :  { %v1982_v56 = vpop.f32.mrf.mxu0  ;;  %2016 = vmatmul.mubr.msk.f32.gmra.mxu1 %vm988_vm9, %v972_v48 }
 0x248   :  { %v973_v57 = vmax.f32 %v933_v55, 0.0  ;;  %v948_v45 = vadd.f32 %v1982_v56, %v2605_v59 }
 0x249   :  { %v942_v58 = vpop.f32.mrf.mxu0 }
 0x24a   :  { %v943_v60 = vadd.f32 %v2605_v59, %v942_v58  ;;  %2018 = vmatprep.mubr.msk.f32.mxu1 %vm988_vm9, %v973_v57  ;;  %v976_v63 = vmax.f32 %v948_v45, 0.0 }
 0x24b   :  { %v1985_v61 = vpop.f32.mrf.mxu0  ;;  %2019 = vmatmul.mubr.msk.f32.gmra.mxu1 %vm988_vm9, %v974_v42 }
 0x24c   :  { %v975_v62 = vmax.f32 %v943_v60, 0.0  ;;  %v958_v0 = vadd.f32 %v1985_v61, %v2605_v59 }
 0x24d   :  { %v952_v1 = vpop.f32.mrf.mxu0 }
 0x24e   :  { %v953_v3 = vadd.f32 %v2605_v59, %v952_v1  ;;  %2021 = vmatprep.mubr.msk.f32.mxu1 %vm988_vm9, %v975_v62  ;;  %v978_v8 = vmax.f32 %v958_v0, 0.0 }
 0x24f   :  { %2022 = vmatmul.mubr.msk.f32.gmra.mxu1 %vm988_vm9, %v976_v63  ;;  %v2037_v4 = vpop.f32.mrf.mxu0 }
 0x250   :  { %v977_v5 = vmax.f32 %v953_v3, 0.0  ;;  %v1357_v6 = vadd.f32 %v2037_v4, %v2641_v2 }
 0x251   :  { %v1351_v10 = vpop.f32.mrf.mxu0 }
 0x252   :  { %v1352_v11 = vadd.f32 %v2641_v2, %v1351_v10  ;;  %2024 = vmatprep.mubr.msk.f32.mxu1 %vm988_vm9, %v977_v5  ;;  %v1441_v12 = vmul.f32 %v2465_v7, %v1357_v6 }
 0x253   :  { %2025 = vmatmul.mubr.msk.f32.gmra.mxu1 %vm988_vm9, %v978_v8  ;;  %v2040_v13 = vpop.f32.mrf.mxu0 }
 0x254   :  { %v1367_v59 = vadd.f32 %v2040_v13, %v2641_v2  ;;  %v1461_v14 = vsel %vm751_vm8, %v1441_v12, 0.0  ;;  %v1440_v16 = vmul.f32 %v1352_v11, %v2469_v9 }
 0x255   :  { %1462 = vadd.xlane.f32.xlu1 %v1461_v14  ;;  %v1361_v17 = vpop.f32.mrf.mxu0 }
 0x256   :  { %v1362_v19 = vadd.f32 %v2641_v2, %v1361_v17  ;;  %v1458_v20 = vsel %vm751_vm8, %v1440_v16, 0.0  ;;  %v1443_v21 = vmul.f32 %v2485_v15, %v1367_v59 }
 0x257   :  { %v2043_v23 = vpop.f32.mrf.mxu0  ;;  %1459 = vadd.xlane.f32.xlu0 %v1458_v20 }
 0x258   :  { %v1377_v25 = vadd.f32 %v2043_v23, %v2641_v2  ;;  %v1467_v27 = vsel %vm751_vm8, %v1443_v21, 0.0  ;;  %v1442_v29 = vmul.f32 %v1362_v19, %v2490_v18 }
 0x259   :  { %v1371_v7 = vpop.f32.mrf.mxu0 }
 0x25a   :  { %v1372_v26 = vadd.f32 %v2641_v2, %v1371_v7  ;;  %v1464_v37 = vsel %vm751_vm8, %v1442_v29, 0.0  ;;  %v1445_v38 = vmul.f32 %v2497_v22, %v1377_v25 }
 0x25b   :  { %v2046_v9 = vpop.f32.mrf.mxu0  ;;  %1468 = vadd.xlane.f32.xlu0 %v1467_v27 }
 0x25c   :  { %v1444_v31 = vmul.f32 %v1372_v26, %v2499_v24  ;;  %v1387_v32 = vadd.f32 %v2046_v9, %v2641_v2  ;;  %v1473_v52 = vsel %vm751_vm8, %v1445_v38, 0.0 }
 0x25d   :  { %v1381_v33 = vpop.f32.mrf.mxu0 }
 0x25e   :  { %v1382_v15 = vadd.f32 %v2641_v2, %v1381_v33  ;;  %v1470_v35 = vsel %vm751_vm8, %v1444_v31, 0.0  ;;  %v1447_v47 = vmul.f32 %v2505_v28, %v1387_v32 }
 0x25f   :  { %v2049_v41 = vpop.f32.mrf.mxu0  ;;  %1471 = vadd.xlane.f32.xlu1 %v1470_v35  ;;  %1465 = vadd.xlane.f32.xlu0 %v1464_v37 }
 0x260   :  { %v1446_v18 = vmul.f32 %v1382_v15, %v2507_v30  ;;  %v1397_v24 = vadd.f32 %v2049_v41, %v2641_v2  ;;  %v1479_v57 = vsel %vm751_vm8, %v1447_v47, 0.0 }
 0x261   :  { %v1391_v43 = vpop.f32.mrf.mxu0 }
 0x262   :  { %v1392_v48 = vadd.f32 %v2641_v2, %v1391_v43  ;;  %v1476_v51 = vsel %vm751_vm8, %v1446_v18, 0.0  ;;  %v1449_v45 = vmul.f32 %v2513_v34, %v1397_v24 }
 0x263   :  { %v2052_v55 = vpop.f32.mrf.mxu0  ;;  %1477 = vadd.xlane.f32.xlu1 %v1476_v51  ;;  %1474 = vadd.xlane.f32.xlu0 %v1473_v52 }
 0x264   :  { %v1448_v22 = vmul.f32 %v1392_v48, %v2515_v36  ;;  %v1407_v30 = vadd.f32 %v2052_v55, %v2641_v2  ;;  %v1485_v0 = vsel %vm751_vm8, %v1449_v45, 0.0 }
 0x265   :  { %v1401_v56 = vpop.f32.mrf.mxu0 }
 0x266   :  { %v1402_v28 = vadd.f32 %v2641_v2, %v1401_v56  ;;  %v1482_v42 = vsel %vm751_vm8, %v1448_v22, 0.0  ;;  %v1451_v1 = vmul.f32 %v2519_v39, %v1407_v30 }
 0x267   :  { %v2055_v58 = vpop.f32.mrf.mxu0  ;;  %1483 = vadd.xlane.f32.xlu1 %v1482_v42  ;;  %1480 = vadd.xlane.f32.xlu0 %v1479_v57 }
 0x268   :  { %v1450_v60 = vmul.f32 %v1402_v28, %v2523_v40  ;;  %v1417_v61 = vadd.f32 %v2055_v58, %v2641_v2  ;;  %v1491_v10 = vsel %vm751_vm8, %v1451_v1, 0.0 }
 0x269   :  { %v1411_v62 = vpop.f32.mrf.mxu0 }
 0x26a   :  { %v1412_v36 = vadd.f32 %v2641_v2, %v1411_v62  ;;  %v1488_v63 = vsel %vm751_vm8, %v1450_v60, 0.0  ;;  %v1453_v5 = vmul.f32 %v2529_v44, %v1417_v61 }
 0x26b   :  { %v2058_v3 = vpop.f32.mrf.mxu0  ;;  %1489 = vadd.xlane.f32.xlu1 %v1488_v63  ;;  %1486 = vadd.xlane.f32.xlu0 %v1485_v0 }
 0x26c   :  { %v1452_v34 = vmul.f32 %v1412_v36, %v2532_v46  ;;  %v1427_v40 = vadd.f32 %v2058_v3, %v2641_v2  ;;  %v1497_v13 = vsel %vm751_vm8, %v1453_v5, 0.0 }
 0x26d   :  { %v1421_v4 = vpop.f32.mrf.mxu0 }
 0x26e   :  { %v1422_v6 = vadd.f32 %v2641_v2, %v1421_v4  ;;  %v1494_v8 = vsel %vm751_vm8, %v1452_v34, 0.0  ;;  %v1455_v14 = vmul.f32 %v2539_v49, %v1427_v40 }
 0x26f   :  { %v2061_v11 = vpop.f32.mrf.mxu0  ;;  %1495 = vadd.xlane.f32.xlu1 %v1494_v8  ;;  %1492 = vadd.xlane.f32.xlu0 %v1491_v10 }
 0x270   :  { %v1454_v39 = vmul.f32 %v1422_v6, %v2542_v50  ;;  %v1437_v46 = vadd.f32 %v2061_v11, %v2641_v2  ;;  %v1503_v19 = vsel %vm751_vm8, %v1455_v14, 0.0 }
 0x271   :  { %v1431_v12 = vpop.f32.mrf.mxu0 }
 0x272   :  { %v1432_v44 = vadd.f32 %v2641_v2, %v1431_v12  ;;  %v1500_v59 = vsel %vm751_vm8, %v1454_v39, 0.0  ;;  %v1457_v50 = vmul.f32 %v2549_v53, %v1437_v46 }
 0x273   :  { %1501 = vadd.xlane.f32.xlu1 %v1500_v59  ;;  %1498 = vadd.xlane.f32.xlu0 %v1497_v13 }
 0x274   :  { %v1456_v16 = vmul.f32 %v1432_v44, %v2552_v54  ;;  %v1509_v20 = vsel %vm751_vm8, %v1457_v50, 0.0 }
 0x276   :  { %v1506_v17 = vsel %vm751_vm8, %v1456_v16, 0.0 }
 0x277   :  { %1507 = vadd.xlane.f32.xlu1 %v1506_v17  ;;  %1504 = vadd.xlane.f32.xlu0 %v1503_v19 }
 0x27b   :  { %1510 = vadd.xlane.f32.xlu0 %v1509_v20 }
 0x2de   :  { %v1463_v21 = vpop.xlane.xlu1 %1462 }
 0x2e0   :  { %v1460_v2 = vpop.xlane.xlu0 %1459 }
 0x2e2   :  { %v2706_v25 = vpop.f32.mrf.mxu1 }
 0x2e4   :  { %v2702_v23 = vpop.xlane.xlu0 %1468  ;;  %v2710_v27 = vpop.f32.mrf.mxu1 }
 0x2e8   :  { %v2704_v49 = vpop.xlane.xlu1 %1471  ;;  %v1466_v7 = vpop.xlane.xlu0 %1465 }
 0x2ea   :  { %v2712_v53 = vpop.f32.mrf.mxu1 }
 0x2ec   :  { %v1478_v54 = vpop.xlane.xlu1 %1477  ;;  %v2708_v26 = vpop.xlane.xlu0 %1474 }
 0x2ed   :  { %v2714_v31 = vpop.f32.mrf.mxu1  ;;  %v1512_v35 = vmax.f32 %v1460_v2, %v1478_v54 }
 0x2f0   :  { %v1484_v29 = vpop.xlane.xlu1 %1483  ;;  %v1481_v9 = vpop.xlane.xlu0 %1480 }
 0x2f1   :  { %v1514_v48 = vmax.f32 %v1466_v7, %v1484_v29  ;;  %v1513_v51 = vmax.f32 %v1463_v21, %v1481_v9 }
 0x2f2   :  { %v2718_v15 = vpop.f32.mrf.mxu1 }
 0x2f4   :  { %v1490_v32 = vpop.xlane.xlu1 %1489  ;;  %v2716_v33 = vpop.xlane.xlu0 %1486 }
 0x2f5   :  { %v2722_v18 = vpop.f32.mrf.mxu1  ;;  %v1516_v42 = vmax.f32 %v2704_v49, %v1490_v32  ;;  %v1515_v45 = vmax.f32 %v2702_v23, %v2716_v33 }
 0x2f8   :  { %v1496_v37 = vpop.xlane.xlu1 %1495  ;;  %v2720_v41 = vpop.xlane.xlu0 %1492 }
 0x2f9   :  { %v1518_v38 = vmax.f32 %v1512_v35, %v1496_v37  ;;  %v1517_v17 = vmax.f32 %v2708_v26, %v2720_v41 }
 0x2fa   :  { %v2724_v52 = vpop.f32.mrf.mxu1 }
 0x2fb   :  { %v1524_v43 = vsub.f32 %v1460_v2, %v1518_v38  ;;  %v1542_v47 = vsub.f32 %v1478_v54, %v1518_v38  ;;  %v1560_v24 = vsub.f32 %v1496_v37, %v1518_v38 }
 0x2fc   :  { %v1502_v55 = vpop.xlane.xlu1 %1501  ;;  %v1499_v57 = vpop.xlane.xlu0 %1498 }
 0x2fd   :  { %v1530_v22 = vmul.f32 1.442695, %v1524_v43  ;;  %v1548_v56 = vmul.f32 1.442695, %v1542_v47  ;;  %v1520_v30 = vmax.f32 %v1514_v48, %v1502_v55  ;;  %v1519_v28 = vmax.f32 %v1513_v51, %v1499_v57  ;;  %v2729_v60 = vpop.f32.mrf.mxu1 }
 0x2fe   :  { %v1566_v58 = vmul.f32 1.442695, %v1560_v24 }
 0x2ff   :  { %2072 = vpow2.f32 %v1530_v22  ;;  %v1526_v61 = vsub.f32 %v1466_v7, %v1520_v30  ;;  %v1544_v62 = vsub.f32 %v1484_v29, %v1520_v30  ;;  %v1562_v36 = vsub.f32 %v1502_v55, %v1520_v30 }
 0x300   :  { %v1508_v63 = vpop.xlane.xlu1 %1507  ;;  %2074 = vpow2.f32 %v1548_v56  ;;  %v1525_v0 = vsub.f32 %v1463_v21, %v1519_v28  ;;  %v1543_v1 = vsub.f32 %v1481_v9, %v1519_v28  ;;  %v1561_v3 = vsub.f32 %v1499_v57, %v1519_v28  ;;  %v1505_v34 = vpop.xlane.xlu0 %1504 }
 0x301   :  { %v1534_v4 = vmul.f32 1.442695, %v1526_v61  ;;  %v1552_v5 = vmul.f32 1.442695, %v1544_v62  ;;  %v1570_v40 = vmul.f32 1.442695, %v1562_v36  ;;  %v1522_v6 = vmax.f32 %v1516_v42, %v1508_v63 }
 0x302   :  { %v2731_v8 = vpop.f32.mrf.mxu1  ;;  %2076 = vpow2.f32 %v1566_v58  ;;  %v1532_v10 = vmul.f32 1.442695, %v1525_v0  ;;  %v1550_v11 = vmul.f32 1.442695, %v1543_v1  ;;  %v1521_v39 = vmax.f32 %v1515_v45, %v1505_v34 }
 0x303   :  { %2078 = vpow2.f32 %v1534_v4  ;;  %v1528_v12 = vsub.f32 %v2704_v49, %v1522_v6  ;;  %v1546_v13 = vsub.f32 %v1490_v32, %v1522_v6  ;;  %v1564_v46 = vsub.f32 %v1508_v63, %v1522_v6 }
 0x304   :  { %v2734_v44 = vpop.f32.mrf.mxu1  ;;  %2080 = vpow2.f32 %v1552_v5  ;;  %v1568_v59 = vmul.f32 1.442695, %v1561_v3  ;;  %v1527_v14 = vsub.f32 %v2702_v23, %v1521_v39  ;;  %v1511_v16 = vpop.xlane.xlu0 %1510  ;;  %v1545_v50 = vsub.f32 %v2716_v33, %v1521_v39 }
 0x305   :  { %2082 = vpow2.f32 %v1570_v40  ;;  %v1538_v19 = vmul.f32 1.442695, %v1528_v12  ;;  %v1556_v20 = vmul.f32 1.442695, %v1546_v13  ;;  %v1563_v2 = vsub.f32 %v1505_v34, %v1521_v39 }
 0x306   :  { %2084 = vpow2.f32 %v1532_v10  ;;  %v1574_v49 = vmul.f32 1.442695, %v1564_v46  ;;  %v1523_v7 = vmax.f32 %v1517_v17, %v1511_v16  ;;  %v1536_v54 = vmul.f32 1.442695, %v1527_v14 }
 0x307   :  { %v2740_v21 = vpop.f32.mrf.mxu1  ;;  %2086 = vpow2.f32 %v1550_v11  ;;  %v1554_v23 = vmul.f32 1.442695, %v1545_v50  ;;  %v1572_v32 = vmul.f32 1.442695, %v1563_v2  ;;  %v2759_v22 = vstv %s2842_s9 }
 0x308   :  { %2088 = vpow2.f32 %v1568_v59  ;;  %v1529_v9 = vsub.f32 %v2708_v26, %v1523_v7  ;;  %v1547_v33 = vsub.f32 %v2720_v41, %v1523_v7  ;;  %v1565_v35 = vsub.f32 %v1511_v16, %v1523_v7 }
 0x309   :  { %v2742_v29 = vpop.f32.mrf.mxu1  ;;  %2090 = vpow2.f32 %v1538_v19  ;;  %v2769_v58 = vadd.f32 %v2706_v25, %v2759_v22  ;;  %v1114_v62 = vadd.f32 %v2710_v27, %v2759_v22  ;;  %v2781_v1 = vadd.f32 %v2712_v53, %v2759_v22 }
 0x30a   :  { %2092 = vpow2.f32 %v1556_v20  ;;  %v1540_v38 = vmul.f32 1.442695, %v1529_v9  ;;  %v1558_v47 = vmul.f32 1.442695, %v1547_v33  ;;  %v1576_v51 = vmul.f32 1.442695, %v1565_v35 }
 0x30b   :  { %v2746_v37 = vpop.f32.mrf.mxu1  ;;  %2094 = vpow2.f32 %v1574_v49  ;;  %v1124_v3 = vadd.f32 %v2714_v31, %v2759_v22  ;;  %v2789_v4 = vadd.f32 %v2718_v15, %v2759_v22  ;;  %v1134_v27 = vadd.f32 %v2722_v18, %v2759_v22 }
 0x30c   :  { %v2748_v43 = vpop.eup %2072  ;;  %2096 = vpow2.f32 %v1536_v54  ;;  %v1203_v53 = vmax.f32 %v2769_v58, 0.0  ;;  %v1149_v31 = vadd.f32 %v2724_v52, %v2759_v22  ;;  %v1154_v6 = vadd.f32 %v2734_v44, %v2759_v22 }
 0x30d   :  { %v1173_v24 = vpop.f32.mrf.mxu1  ;;  %v2750_v48 = vpop.eup %2074  ;;  %2098 = vpow2.f32 %v1554_v23  ;;  %v1202_v11 = vmax.f32 %v1114_v62, 0.0  ;;  %v1205_v12 = vmax.f32 %v2781_v1, 0.0  ;;  %v1204_v13 = vmax.f32 %v1124_v3, 0.0 }
 0x30e   :  { %2100 = vpow2.f32 %v1572_v32  ;;  %v1584_v56 = vadd.f32 %v2750_v48, %v2748_v43  ;;  %v1144_v46 = vadd.f32 %v2729_v60, %v2759_v22  ;;  %v1174_v59 = vadd.f32 %v1173_v24, %v2759_v22 }
 0x30f   :  { %v2752_v26 = vpop.f32.mrf.mxu1  ;;  %v2754_v55 = vpop.eup %2076  ;;  %2102 = vpow2.f32 %v1540_v38  ;;  %v1207_v16 = vmax.f32 %v2789_v4, 0.0  ;;  %v1206_v44 = vmax.f32 %v1134_v27, 0.0  ;;  %v1209_v20 = vmax.f32 %v1149_v31, 0.0 }
 0x310   :  { %v2079_v41 = vpop.eup %2078  ;;  %2104 = vpow2.f32 %v1558_v47  ;;  %v1602_v36 = vadd.f32 %v2754_v55, %v1584_v56  ;;  %v1159_v49 = vadd.f32 %v2731_v8, %v2759_v22  ;;  %v1210_v7 = vmax.f32 %v1154_v6, 0.0 }
 0x311   :  { %v2081_v57 = vpop.eup %2080  ;;  %v1183_v30 = vpop.f32.mrf.mxu1  ;;  %2106 = vpow2.f32 %v1576_v51  ;;  %v1164_v60 = vadd.f32 %v2742_v29, %v2759_v22  ;;  %v1208_v33 = vmax.f32 %v1144_v46, 0.0  ;;  %v1169_v38 = vadd.f32 %v2740_v21, %v2759_v22 }
 0x312   :  { %v2763_v28 = vpop.eup %2082  ;;  %v1586_v42 = vadd.f32 %v2081_v57, %v2079_v41  ;;  %v1184_v39 = vadd.f32 %v1183_v30, %v2759_v22  ;;  %v1214_v47 = vmax.f32 %v1174_v59, 0.0  ;;  %v1580_v24 = vmul.f32 %v2079_v41, %v1204_v13 }
 0x313   :  { %v2765_v45 = vpop.eup %2084  ;;  %v2785_v25 = vpop.f32.mrf.mxu1  ;;  %v1592_v51 = vmul.f32 %v2081_v57, %v1210_v7  ;;  %v1578_v30 = vmul.f32 %v2748_v43, %v1202_v11  ;;  %v1211_v29 = vmax.f32 %v1159_v49, 0.0  ;;  %v1212_v62 = vmax.f32 %v1164_v60, 0.0 }
 0x314   :  { %v2771_v61 = vpop.eup %2086  ;;  %v1604_v63 = vadd.f32 %v2763_v28, %v1586_v42  ;;  %v1216_v23 = vmax.f32 %v1184_v39, 0.0  ;;  %v1590_v42 = vmul.f32 %v2750_v48, %v1208_v33  ;;  %v1213_v1 = vmax.f32 %v1169_v38, 0.0 }
 0x315   :  { %v2777_v0 = vpop.eup %2088  ;;  %v1585_v5 = vadd.f32 %v2771_v61, %v2765_v45  ;;  %v1193_v14 = vpop.f32.mrf.mxu1  ;;  %v1179_v21 = vadd.f32 %v2746_v37, %v2759_v22  ;;  %v1608_v41 = vmul.f32 %v2754_v55, %v1214_v47  ;;  %v1189_v57 = vadd.f32 %v2752_v26, %v2759_v22 }
 0x316   :  { %v2091_v34 = vpop.eup %2090  ;;  %2108 = vrcp.f32 %v1604_v63  ;;  %v1194_v9 = vadd.f32 %v1193_v14, %v2759_v22  ;;  %v1598_v3 = vadd.f32 %v1592_v51, %v1580_v24  ;;  %v1596_v27 = vadd.f32 %v1590_v42, %v1578_v30 }
 0x317   :  { %v2093_v40 = vpop.eup %2092  ;;  %2110 = vrcp.f32 %v1602_v36  ;;  %v1603_v17 = vadd.f32 %v2777_v0, %v1585_v5  ;;  %v1610_v36 = vmul.f32 %v2763_v28, %v1216_v23  ;;  %v1582_v43 = vmul.f32 %v2091_v34, %v1206_v44 }
 0x318   :  { %v2095_v10 = vpop.eup %2094  ;;  %v1588_v15 = vadd.f32 %v2093_v40, %v2091_v34  ;;  %v1218_v63 = vmax.f32 %v1194_v9, 0.0  ;;  %v1594_v48 = vmul.f32 %v2093_v40, %v1212_v62  ;;  %v1199_v28 = vadd.f32 %v2785_v25, %v2759_v22 }
 0x319   :  { %v2097_v18 = vpop.eup %2096  ;;  %v1579_v6 = vmul.f32 %v2765_v45, %v1203_v53  ;;  %v1591_v37 = vmul.f32 %v2771_v61, %v1209_v20  ;;  %v1616_v11 = vadd.f32 %v1610_v36, %v1598_v3  ;;  %v1215_v39 = vmax.f32 %v1179_v21, 0.0 }
 0x31a   :  { %v2099_v52 = vpop.eup %2098  ;;  %v1606_v19 = vadd.f32 %v2095_v10, %v1588_v15  ;;  %v1581_v5 = vmul.f32 %v2097_v18, %v1205_v12  ;;  %v1612_v55 = vmul.f32 %v2095_v10, %v1218_v63  ;;  %v1614_v26 = vadd.f32 %v1608_v41, %v1596_v27 }
 0x31b   :  { %v2101_v50 = vpop.eup %2100  ;;  %v1587_v2 = vadd.f32 %v2099_v52, %v2097_v18  ;;  %v1593_v31 = vmul.f32 %v2099_v52, %v1211_v29  ;;  %v1217_v13 = vmax.f32 %v1189_v57, 0.0  ;;  %v1600_v40 = vadd.f32 %v1594_v48, %v1582_v43 }
 0x31c   :  { %v2103_v54 = vpop.eup %2102  ;;  %2112 = vrcp.f32 %v1606_v19  ;;  %v1597_v18 = vadd.f32 %v1591_v37, %v1579_v6  ;;  %v1219_v52 = vmax.f32 %v1199_v28, 0.0  ;;  %v1609_v61 = vmul.f32 %v2777_v0, %v1215_v39 }
 0x31d   :  { %v2105_v32 = vpop.eup %2104  ;;  %v1605_v35 = vadd.f32 %v2101_v50, %v1587_v2  ;;  %2114 = vrcp.f32 %v1603_v17  ;;  %v1583_v46 = vmul.f32 %v2103_v54, %v1207_v16  ;;  %v1599_v14 = vadd.f32 %v1593_v31, %v1581_v5 }
 0x31e   :  { %v1589_v8 = vadd.f32 %v2105_v32, %v2103_v54  ;;  %v2107_v56 = vpop.eup %2106  ;;  %v1595_v34 = vmul.f32 %v2105_v32, %v1213_v1  ;;  %v1618_v44 = vadd.f32 %v1612_v55, %v1600_v40  ;;  %v1611_v25 = vmul.f32 %v2101_v50, %v1217_v13 }
 0x31f   :  { %2116 = vrcp.f32 %v1605_v35  ;;  %v1615_v16 = vadd.f32 %v1609_v61, %v1597_v18  ;;  %v1613_v2 = vmul.f32 %v2107_v56, %v1219_v52 }
 0x320   :  { %v1607_v58 = vadd.f32 %v2107_v56, %v1589_v8  ;;  %v1601_v45 = vadd.f32 %v1595_v34, %v1583_v46  ;;  %v1617_v19 = vadd.f32 %v1611_v25, %v1599_v14 }
 0x322   :  { %2118 = vrcp.f32 %v1607_v58  ;;  %v1619_v60 = vadd.f32 %v1613_v2, %v1601_v45 }
 0x323   :  { %v2109_v4 = vpop.eup %2108 }
 0x324   :  { %v2111_v15 = vpop.eup %2110  ;;  %v1628_v59 = vmul.f32 %v2109_v4, %v1616_v11 }
 0x325   :  { %v1626_v12 = vmul.f32 %v2111_v15, %v1614_v26 }
 0x327   :  { %v1632_v53 = vadd.f32 %v1628_v59, %v1626_v12 }
 0x329   :  { %v2113_v22 = vpop.eup %2112 }
 0x32a   :  { %v1630_v10 = vmul.f32 %v2113_v22, %v1618_v44  ;;  %v2115_v17 = vpop.eup %2114 }
 0x32b   :  { %v1627_v54 = vmul.f32 %v2115_v17, %v1615_v16 }
 0x32c   :  { %v2117_v20 = vpop.eup %2116  ;;  %v1634_v49 = vadd.f32 %v1632_v53, %v1630_v10 }
 0x32d   :  { %v1629_v7 = vmul.f32 %v2117_v20, %v1617_v19 }
 0x32e   :  { %1637 = vst.msk [vmem:[%s2843_s10] sm:$0xff] %vm1636_vm10, %v1634_v49 }
 0x32f   :  { %v2119_v50 = vpop.eup %2118  ;;  %v1633_v23 = vadd.f32 %v1629_v7, %v1627_v54 }
 0x330   :  { %v1631_v9 = vmul.f32 %v2119_v50, %v1619_v60 }
 0x332   :  { %v1635_v0 = vadd.f32 %v1633_v23, %v1631_v9 }
 0x334   :  { %1638 = vst.msk [vmem:[%s2843_s10 + $0x8] sm:$0xff] %vm1636_vm10, %v1635_v0 }

</bundles_post_ra>
